<compile_context>
chip_gen: v7x
topology: tpu7x:2x2x1
jax: 0.10.0
libtpu: 0.0.40
codegen_flags: <defaults>
</compile_context>

<pallas_src>
import functools

import jax
import jax.numpy as jnp
from jax.experimental import pallas as pl
from jax.experimental.pallas import tpu as pltpu


_VMEM_LIMIT = 32 * 1024 * 1024


def _ru(x, m):
    return (x + m - 1) // m * m


# ----------------------------------------------------------------------------
# Tiled MXU matmul: (M,K) @ (K,N) + bias, fused relu / leaky-relu(0.2)
# ----------------------------------------------------------------------------
def _matmul_kernel(a_ref, b_ref, bias_ref, o_ref, acc_ref, *, act):
    k = pl.program_id(2)

    @pl.when(k == 0)
    def _():
        acc_ref[...] = jnp.zeros_like(acc_ref)

    acc_ref[...] += jnp.dot(a_ref[...], b_ref[...],
                            preferred_element_type=jnp.float32)

    @pl.when(k == pl.num_programs(2) - 1)
    def _():
        y = acc_ref[...] + bias_ref[...]
        if act == "leaky":
            y = jnp.where(y >= 0.0, y, 0.2 * y)
        elif act == "relu":
            y = jnp.maximum(y, 0.0)
        o_ref[...] = y.astype(o_ref.dtype)


@functools.lru_cache(maxsize=None)
def _matmul_call(Mp, Kp, Np, tm, tk, tn, act, out_dtype):
    f = pl.pallas_call(
        functools.partial(_matmul_kernel, act=act),
        out_shape=jax.ShapeDtypeStruct((Mp, Np), jnp.dtype(out_dtype)),
        grid_spec=pltpu.PrefetchScalarGridSpec(
            num_scalar_prefetch=0,
            grid=(Mp // tm, Np // tn, Kp // tk),
            in_specs=[
                pl.BlockSpec((tm, tk), lambda i, j, k: (i, k)),
                pl.BlockSpec((tk, tn), lambda i, j, k: (k, j)),
                pl.BlockSpec((1, tn), lambda i, j, k: (0, j)),
            ],
            out_specs=pl.BlockSpec((tm, tn), lambda i, j, k: (i, j)),
            scratch_shapes=[pltpu.VMEM((tm, tn), jnp.float32)]),
        compiler_params=pltpu.CompilerParams(
            dimension_semantics=("parallel", "parallel", "arbitrary"),
            vmem_limit_bytes=_VMEM_LIMIT),
    )
    return jax.jit(f)


def _pick_tm(M):
    return 256 if M >= 256 else _ru(M, 8)


def _pick_tn(N):
    return 256 if N >= 256 else _ru(N, 128)


def _pick_tk(Kp):
    if Kp <= 2048:
        return Kp
    for cand in (2048, 1024, 512, 384, 256, 128):
        if Kp % cand == 0:
            return cand
    return 128


def prepare_conv_weight(w, b):
    """Pad/reshape/cast a conv weight ONCE: (KH,KW,Cin,Cout) -> bf16 (Kp, Np)."""
    kh, kw, cin, cout = w.shape
    K, N = kh * kw * cin, cout
    Kp = _ru(K, 128)
    tn = _pick_tn(N)
    Np = _ru(N, tn)
    w_p = jnp.zeros((Kp, Np), jnp.bfloat16).at[:K, :N].set(
        w.reshape(K, N).astype(jnp.bfloat16))
    bias_p = jnp.zeros((1, Np), jnp.float32)
    if b is not None:
        bias_p = bias_p.at[0, :N].set(b.astype(jnp.float32))
    return dict(w=w_p, bias=bias_p, K=K, N=N, Kp=Kp, Np=Np, tn=tn, kh=kh, kw=kw)


def matmul_prepared(a, wp, act="none", out_dtype=jnp.bfloat16):
    M, K = a.shape
    assert K == wp["K"]
    tm = _pick_tm(M)
    Mp = _ru(M, tm)
    Kp, Np, tn = wp["Kp"], wp["Np"], wp["tn"]
    tk = _pick_tk(Kp)
    a_p = jnp.pad(a.astype(jnp.bfloat16), ((0, Mp - M), (0, Kp - K)))
    out = _matmul_call(Mp, Kp, Np, tm, tk, tn, act,
                       jnp.dtype(out_dtype).name)(a_p, wp["w"], wp["bias"])
    return out[:M, :wp["N"]]


# ----------------------------------------------------------------------------
# Conv glue (im2col + tiled matmul), maxpool
# ----------------------------------------------------------------------------
def _im2col(x_nhwc, kh, kw, stride, pad):
    x = jnp.pad(x_nhwc, ((0, 0), (pad, pad), (pad, pad), (0, 0)))
    n, hp, wp_, c = x.shape
    oh = (hp - kh) // stride + 1
    ow = (wp_ - kw) // stride + 1
    cols = []
    for i in range(kh):
        for j in range(kw):
            cols.append(x[:, i:i + stride * oh:stride, j:j + stride * ow:stride, :])
    patches = jnp.stack(cols, axis=-2)                 # (N, oh, ow, kh*kw, C)
    return patches.reshape(n * oh * ow, kh * kw * c), (n, oh, ow)


def conv2d(x_nhwc, wp, stride, pad, act="none", out_dtype=jnp.bfloat16):
    patches, (n, oh, ow) = _im2col(x_nhwc.astype(jnp.bfloat16),
                                   wp["kh"], wp["kw"], stride, pad)
    y = matmul_prepared(patches, wp, act=act, out_dtype=out_dtype)
    return y.reshape(n, oh, ow, wp["N"])


def maxpool2x2(x_nhwc):
    # TODO(synk): 2x2 max-pool kept as a JAX reshape/max (tiny reduction glue).
    n, h, w, c = x_nhwc.shape
    return x_nhwc.reshape(n, h // 2, 2, w // 2, 2, c).max(axis=(2, 4))


# ----------------------------------------------------------------------------
# Two-pass tiled BatchNorm (train mode batch stats) + LeakyReLU(0.2)
# ----------------------------------------------------------------------------
def _bn_stats_kernel(x_ref, s_ref, s2_ref):
    t = pl.program_id(0)

    @pl.when(t == 0)
    def _():
        s_ref[...] = jnp.zeros_like(s_ref)
        s2_ref[...] = jnp.zeros_like(s2_ref)

    x = x_ref[...].astype(jnp.float32)
    s_ref[...] += jnp.sum(x, axis=0, keepdims=True)
    s2_ref[...] += jnp.sum(x * x, axis=0, keepdims=True)


@functools.lru_cache(maxsize=None)
def _bn_stats_call(Rp, C, tr):
    f = pl.pallas_call(
        _bn_stats_kernel,
        out_shape=(jax.ShapeDtypeStruct((1, C), jnp.float32),
                   jax.ShapeDtypeStruct((1, C), jnp.float32)),
        grid_spec=pltpu.PrefetchScalarGridSpec(
            num_scalar_prefetch=0,
            grid=(Rp // tr,),
            in_specs=[pl.BlockSpec((tr, C), lambda t: (t, 0))],
            out_specs=(pl.BlockSpec((1, C), lambda t: (0, 0)),
                       pl.BlockSpec((1, C), lambda t: (0, 0)))),
        compiler_params=pltpu.CompilerParams(
            dimension_semantics=("arbitrary",),
            vmem_limit_bytes=_VMEM_LIMIT),
    )
    return jax.jit(f)


def _bn_apply_kernel(x_ref, s_ref, s2_ref, g_ref, b_ref, o_ref, *, count):
    x = x_ref[...].astype(jnp.float32)
    mean = s_ref[...] * (1.0 / count)
    var = s2_ref[...] * (1.0 / count) - mean * mean
    y = (x - mean) * jax.lax.rsqrt(var + 1e-5) * g_ref[...] + b_ref[...]
    o_ref[...] = jnp.where(y >= 0.0, y, 0.2 * y).astype(o_ref.dtype)


@functools.lru_cache(maxsize=None)
def _bn_apply_call(Rp, C, tr, count, out_dtype):
    f = pl.pallas_call(
        functools.partial(_bn_apply_kernel, count=float(count)),
        out_shape=jax.ShapeDtypeStruct((Rp, C), jnp.dtype(out_dtype)),
        grid_spec=pltpu.PrefetchScalarGridSpec(
            num_scalar_prefetch=0,
            grid=(Rp // tr,),
            in_specs=[pl.BlockSpec((tr, C), lambda t: (t, 0)),
                      pl.BlockSpec((1, C), lambda t: (0, 0)),
                      pl.BlockSpec((1, C), lambda t: (0, 0)),
                      pl.BlockSpec((1, C), lambda t: (0, 0)),
                      pl.BlockSpec((1, C), lambda t: (0, 0))],
            out_specs=pl.BlockSpec((tr, C), lambda t: (t, 0))),
        compiler_params=pltpu.CompilerParams(
            dimension_semantics=("parallel",),
            vmem_limit_bytes=_VMEM_LIMIT),
    )
    return jax.jit(f)


def batchnorm_lrelu(x_nhwc, gamma, beta):
    n, h, w, c = x_nhwc.shape
    R = n * h * w
    tr = 512 if R >= 512 else _ru(R, 8)
    Rp = _ru(R, tr)
    x2 = jnp.pad(x_nhwc.reshape(R, c).astype(jnp.bfloat16), ((0, Rp - R), (0, 0)))
    s, s2 = _bn_stats_call(Rp, c, tr)(x2)
    y = _bn_apply_call(Rp, c, tr, R, "bfloat16")(x2, s, s2, gamma, beta)
    return y[:R].reshape(n, h, w, c)


# ----------------------------------------------------------------------------
# Fused LPIPS tail: unit-normalize + sq-diff + 1x1 lin weighting + spatial sum
# ----------------------------------------------------------------------------
def _lpips_tail_kernel(a_ref, b_ref, w_ref, o_ref, acc_ref):
    t = pl.program_id(0)

    @pl.when(t == 0)
    def _():
        acc_ref[...] = jnp.zeros_like(acc_ref)

    a = a_ref[...].astype(jnp.float32)            # (N, tr, C)
    b = b_ref[...].astype(jnp.float32)
    an = a / (jnp.sqrt(jnp.sum(a * a, axis=-1, keepdims=True)) + 1e-10)
    bn = b / (jnp.sqrt(jnp.sum(b * b, axis=-1, keepdims=True)) + 1e-10)
    d = (an - bn) * (an - bn)
    w = w_ref[...].astype(jnp.float32)            # (1, 1, C)
    part = jnp.sum(jnp.sum(d * w, axis=-1, keepdims=True), axis=-2)   # (N, 1)
    acc_ref[...] += part                          # broadcast over lanes

    @pl.when(t == pl.num_programs(0) - 1)
    def _():
        o_ref[...] = acc_ref[...]


@functools.lru_cache(maxsize=None)
def _lpips_tail_call(N, HWp, C, tr):
    f = pl.pallas_call(
        _lpips_tail_kernel,
        out_shape=jax.ShapeDtypeStruct((N, 128), jnp.float32),
        grid_spec=pltpu.PrefetchScalarGridSpec(
            num_scalar_prefetch=0,
            grid=(HWp // tr,),
            in_specs=[pl.BlockSpec((N, tr, C), lambda t: (0, t, 0)),
                      pl.BlockSpec((N, tr, C), lambda t: (0, t, 0)),
                      pl.BlockSpec((1, 1, C), lambda t: (0, 0, 0))],
            out_specs=pl.BlockSpec((N, 128), lambda t: (0, 0)),
            scratch_shapes=[pltpu.VMEM((N, 128), jnp.float32)]),
        compiler_params=pltpu.CompilerParams(
            dimension_semantics=("arbitrary",),
            vmem_limit_bytes=_VMEM_LIMIT),
    )
    return jax.jit(f)


# ----------------------------------------------------------------------------
# Tiled scalar reductions (abs-diff sum, KL sum, sum, hinge sums)
# ----------------------------------------------------------------------------
def _make_reduce_kernel(op, nin):
    def kernel(*args):
        o_ref = args[nin]
        t = pl.program_id(0)

        @pl.when(t == 0)
        def _():
            o_ref[...] = jnp.zeros_like(o_ref)

        xs = [args[i][...].astype(jnp.float32) for i in range(nin)]
        if op == "absdiff":
            v = jnp.abs(xs[0] - xs[1])
        elif op == "kl":
            m = xs[0]
            lv = jnp.clip(xs[1], -30.0, 20.0)
            v = 0.5 * (m * m + jnp.exp(lv) - 1.0 - lv)
        elif op == "sum":
            v = xs[0]
        elif op == "hinge_real":
            v = jnp.maximum(1.0 - xs[0], 0.0)
        elif op == "hinge_fake":
            v = jnp.maximum(1.0 + xs[0], 0.0)
        else:
            raise ValueError(op)
        o_ref[...] += jnp.reshape(jnp.sum(v), (1, 1))
    return kernel


@functools.lru_cache(maxsize=None)
def _reduce_call(op, nin, Rp, tr):
    f = pl.pallas_call(
        _make_reduce_kernel(op, nin),
        out_shape=jax.ShapeDtypeStruct((1, 1), jnp.float32),
        grid_spec=pltpu.PrefetchScalarGridSpec(
            num_scalar_prefetch=0,
            grid=(Rp // tr,),
            in_specs=[pl.BlockSpec((tr, 128), lambda t: (t, 0))
                      for _ in range(nin)],
            out_specs=pl.BlockSpec((1, 1), lambda t: (0, 0))),
        compiler_params=pltpu.CompilerParams(
            dimension_semantics=("arbitrary",),
            vmem_limit_bytes=_VMEM_LIMIT),
    )
    return jax.jit(f)


def pallas_reduce(op, *arrays, pad_value=0.0):
    """Sum of elementwise op over all elements (padding is chosen op-neutral)."""
    flats = [a.reshape(-1).astype(jnp.float32) for a in arrays]
    n = flats[0].size
    rows = _ru(n, 128) // 128
    tr = 512 if rows >= 512 else _ru(rows, 8)
    Rp = _ru(rows, tr)
    total = Rp * 128
    padded = [jnp.pad(f, (0, total - n), constant_values=pad_value).reshape(Rp, 128)
              for f in flats]
    return _reduce_call(op, len(arrays), Rp, tr)(*padded)[0, 0]


# ----------------------------------------------------------------------------
# LPIPS (VGG16 features, synthetic deterministic weights)
# ----------------------------------------------------------------------------
VGG_CFG = [64, 64, "M", 128, 128, "M", 256, 256, 256, "M", 512, 512, 512, "M",
           512, 512, 512]
LPIPS_CHNS = [64, 128, 256, 512, 512]
_RECORD_AFTER_CONV = {2, 4, 7, 10, 13}   # relu1_2, relu2_2, relu3_3, relu4_3, relu5_3


def vgg_features(vgg_prepared, x_nchw):
    x = jnp.transpose(x_nchw, (0, 2, 3, 1)).astype(jnp.bfloat16)   # NHWC
    feats = []
    conv_idx = 0
    nconv = 0
    for layer in VGG_CFG:
        if layer == "M":
            x = maxpool2x2(x)
        else:
            x = conv2d(x, vgg_prepared[conv_idx], stride=1, pad=1, act="relu")
            conv_idx += 1
            nconv += 1
            if nconv in _RECORD_AFTER_CONV:
                feats.append(x)
    return feats


def lpips_forward(prepared, in0_nchw, in1_nchw):
    shift = jnp.array([-0.030, -0.088, -0.188], jnp.float32).reshape(1, 3, 1, 1)
    scale = jnp.array([0.458, 0.448, 0.450], jnp.float32).reshape(1, 3, 1, 1)
    n = in0_nchw.shape[0]
    # Run both branches through VGG in one concatenated pass.
    x = jnp.concatenate([(in0_nchw - shift) / scale,
                         (in1_nchw - shift) / scale], axis=0)
    feats = vgg_features(prepared["vgg"], x)
    total = jnp.zeros((n,), jnp.float32)
    for kk, f in enumerate(feats):
        _, h, w, c = f.shape
        hw = h * w
        tr = 512 if hw >= 512 else _ru(hw, 8)
        hwp = _ru(hw, tr)
        a = jnp.pad(f[:n].reshape(n, hw, c), ((0, 0), (0, hwp - hw), (0, 0)))
        b = jnp.pad(f[n:].reshape(n, hw, c), ((0, 0), (0, hwp - hw), (0, 0)))
        s = _lpips_tail_call(n, hwp, c, tr)(a, b, prepared["lins"][kk])  # (n,128)
        total = total + s[:, 0] / hw                                     # spatial mean
    return total.reshape(n, 1, 1, 1)


# ----------------------------------------------------------------------------
# NLayerDiscriminator (PatchGAN), n_layers=3, ndf=64, input_nc=3, train-mode BN
# ----------------------------------------------------------------------------
def discriminator_forward(prepared, x_nchw):
    x = jnp.transpose(x_nchw, (0, 2, 3, 1))
    d = prepared["disc"]
    x = conv2d(x, d[0]["wp"], stride=2, pad=1, act="leaky")
    for i in (1, 2, 3):
        stride = 2 if i < 3 else 1
        x = conv2d(x, d[i]["wp"], stride=stride, pad=1, act="none")
        x = batchnorm_lrelu(x, d[i]["gamma"], d[i]["beta"])
    x = conv2d(x, d[4]["wp"], stride=1, pad=1, act="none", out_dtype=jnp.float32)
    return jnp.transpose(x, (0, 3, 1, 2))     # NCHW logits


# ----------------------------------------------------------------------------
# Parameter init (deterministic, synthetic) + one-time prepare (pad/cast)
# ----------------------------------------------------------------------------
def init_params(key):
    keys = list(jax.random.split(key, 32))
    kpop = iter(keys)

    vgg = []
    cin = 3
    for layer in VGG_CFG:
        if layer == "M":
            continue
        cout = layer
        std = (2.0 / (9.0 * cin)) ** 0.5
        w = jax.random.normal(next(kpop), (3, 3, cin, cout), jnp.float32) * std
        b = jnp.zeros((cout,), jnp.float32)
        vgg.append((w, b))
        cin = cout

    lins = [jnp.abs(jax.random.normal(next(kpop), (c,), jnp.float32)) / c
            for c in LPIPS_CHNS]

    disc = []
    chans = [(3, 64), (64, 128), (128, 256), (256, 512), (512, 1)]
    for idx, (ci, co) in enumerate(chans):
        w = jax.random.normal(next(kpop), (4, 4, ci, co), jnp.float32) * 0.02
        layer = {"w": w}
        if idx in (0, 4):                                 # bias, no BatchNorm
            layer["b"] = jnp.zeros((co,), jnp.float32)
        else:                                             # bias=False + BatchNorm
            layer["gamma"] = 1.0 + 0.02 * jax.random.normal(next(kpop), (co,), jnp.float32)
            layer["beta"] = jnp.zeros((co,), jnp.float32)
        disc.append(layer)

    return {"logvar": jnp.zeros((), jnp.float32), "vgg": vgg, "lins": lins,
            "disc": disc}


def prepare_params(params):
    """Pad / reshape / bf16-cast all matmul weights exactly once."""
    vggp = [prepare_conv_weight(w, b) for (w, b) in params["vgg"]]
    linsp = [w.reshape(1, 1, -1).astype(jnp.float32) for w in params["lins"]]
    discp = []
    for layer in params["disc"]:
        entry = {"wp": prepare_conv_weight(layer["w"], layer.get("b"))}
        if "gamma" in layer:
            c = layer["gamma"].shape[0]
            entry["gamma"] = layer["gamma"].reshape(1, c).astype(jnp.float32)
            entry["beta"] = layer["beta"].reshape(1, c).astype(jnp.float32)
        discp.append(entry)
    return {"logvar": params["logvar"], "vgg": vggp, "lins": linsp, "disc": discp}


# ----------------------------------------------------------------------------
# LPIPSWithDiscriminator.forward
# ----------------------------------------------------------------------------
def lpips_with_discriminator_forward(prepared, cfg, inputs, reconstructions,
                                     post_mean, post_logvar, optimizer_idx,
                                     global_step, split="train"):
    n = inputs.shape[0]
    numel = inputs.size
    per_sample_elems = numel // n
    pw = float(cfg["perceptual_weight"])

    # sum(|x - xrec|) over everything (tiled Pallas reduction)
    rec_abs_sum = pallas_reduce("absdiff", inputs, reconstructions)

    if pw > 0.0:
        p_loss = lpips_forward(prepared, inputs, reconstructions)       # (N,1,1,1)
        rec_sum = rec_abs_sum + pw * jnp.sum(p_loss) * per_sample_elems
    else:
        p_loss = jnp.zeros((n, 1, 1, 1), jnp.float32)
        rec_sum = rec_abs_sum

    # nll = rec/exp(logvar) + logvar  (elementwise) -> sums are pure scalar math
    lv = prepared["logvar"]
    nll_sum = rec_sum / jnp.exp(lv) + lv * numel
    weighted_nll_loss = nll_sum / n     # weights is None
    nll_loss = nll_sum / n

    kl_sum = pallas_reduce("kl", post_mean, post_logvar)
    kl_loss = kl_sum / n

    disc_factor = cfg["disc_factor"] if global_step >= cfg["disc_start"] else 0.0

    if optimizer_idx == 0:
        logits_fake = discriminator_forward(prepared, reconstructions)
        g_loss = -(pallas_reduce("sum", logits_fake) / logits_fake.size)
        # TODO(synk): calculate_adaptive_weight needs torch.autograd.grad of nll/g_loss
        # w.r.t. the external decoder's last layer (a graph that does not exist in this
        # functional mirror); follow the module's RuntimeError/eval fallback -> 0.0.
        d_weight = jnp.asarray(0.0, jnp.float32)
        loss = (weighted_nll_loss + cfg["kl_weight"] * kl_loss
                + d_weight * disc_factor * g_loss)
        log = {
            f"{split}/total_loss": loss,
            f"{split}/logvar": prepared["logvar"],
            f"{split}/kl_loss": kl_loss,
            f"{split}/nll_loss": nll_loss,
            f"{split}/rec_loss": rec_sum / numel,
            f"{split}/d_weight": d_weight,
            f"{split}/disc_factor": jnp.asarray(disc_factor, jnp.float32),
            f"{split}/g_loss": g_loss,
        }
        return loss, log

    if optimizer_idx == 1:
        logits_real = discriminator_forward(prepared, inputs)
        logits_fake = discriminator_forward(prepared, reconstructions)
        hr = pallas_reduce("hinge_real", logits_real, pad_value=1.0)
        hf = pallas_reduce("hinge_fake", logits_fake, pad_value=-1.0)
        hinge = 0.5 * (hr / logits_real.size + hf / logits_fake.size)
        d_loss = disc_factor * hinge
        log = {
            f"{split}/disc_loss": d_loss,
            f"{split}/logits_real": pallas_reduce("sum", logits_real) / logits_real.size,
            f"{split}/logits_fake": pallas_reduce("sum", logits_fake) / logits_fake.size,
        }
        return d_loss, log


# ----------------------------------------------------------------------------
if __name__ == "__main__":
    key = jax.random.PRNGKey(0)
    kp, k1, k2, k3, k4 = jax.random.split(key, 5)
    params = init_params(kp)
    prepared = prepare_params(params)
    cfg = dict(disc_start=0, kl_weight=1.0, pixelloss_weight=1.0,
               disc_factor=1.0, disc_weight=1.0, perceptual_weight=1.0)

    inputs = jax.random.uniform(k1, (2, 3, 32, 32), jnp.float32, -1.0, 1.0)
    reconstructions = jax.random.uniform(k2, (2, 3, 32, 32), jnp.float32, -1.0, 1.0)
    post_mean = jax.random.normal(k3, (2, 4, 8, 8), jnp.float32)
    post_logvar = 0.1 * jax.random.normal(k4, (2, 4, 8, 8), jnp.float32)

    loss_g, log_g = lpips_with_discriminator_forward(
        prepared, cfg, inputs, reconstructions, post_mean, post_logvar,
        optimizer_idx=0, global_step=10)
    loss_d, log_d = lpips_with_discriminator_forward(
        prepared, cfg, inputs, reconstructions, post_mean, post_logvar,
        optimizer_idx=1, global_step=10)

    jax.block_until_ready((loss_g, log_g, loss_d, log_d))
    print("KERNEL_OK")
</pallas_src>

<mosaic_0001>
module attributes {stable_mosaic.version = 11 : i64} {
  func.func @kernel(%arg0: i32, %arg1: memref<48x128xf32, #tpu.memory_space<vmem>>, %arg2: memref<48x128xf32, #tpu.memory_space<vmem>>, %arg3: memref<1x1xf32, #tpu.memory_space<vmem>>) attributes {dimension_semantics = [#tpu.dimension_semantics<arbitrary>], iteration_bounds = array<i64: 1>, scalar_prefetch = 0 : i64, scratch_operands = 0 : i64, tpu.core_type = #tpu.core_type<tc>, window_params = [{transform_indices = @transform_0, window_bounds = array<i64: 48, 128>}, {transform_indices = @transform_1, window_bounds = array<i64: 48, 128>}, {pipeline_mode = #tpu.pipeline_mode<synchronous>, transform_indices = @transform_2, window_bounds = array<i64: 1, 1>}]} {
    %c0_i32 = arith.constant 0 : i32
    %0 = arith.cmpi eq, %arg0, %c0_i32 : i32
    %1 = arith.extui %0 : i1 to i32
    %c0_i32_0 = arith.constant 0 : i32
    %2 = arith.cmpi ne, %1, %c0_i32_0 : i32
    scf.if %2 {
      %cst_8 = arith.constant 0.000000e+00 : f32
      %15 = vector.broadcast %cst_8 : f32 to vector<1x1xf32>
      %c0_9 = arith.constant 0 : index
      %c0_10 = arith.constant 0 : index
      %16 = vector.load %arg3[%c0_9, %c0_10] : memref<1x1xf32, #tpu.memory_space<vmem>>, vector<1x1xf32>
      tpu.vector_store %arg3[%c0_9, %c0_10], %15 {strides = array<i32>} : memref<1x1xf32, #tpu.memory_space<vmem>>, vector<1x1xf32>,
    } else {
    }
    %c0 = arith.constant 0 : index
    %c0_1 = arith.constant 0 : index
    %3 = vector.load %arg1[%c0, %c0_1] : memref<48x128xf32, #tpu.memory_space<vmem>>, vector<48x128xf32>
    %c0_2 = arith.constant 0 : index
    %c0_3 = arith.constant 0 : index
    %4 = vector.load %arg2[%c0_2, %c0_3] : memref<48x128xf32, #tpu.memory_space<vmem>>, vector<48x128xf32>
    %5 = arith.subf %3, %4 : vector<48x128xf32>
    %6 = math.absf %5 : vector<48x128xf32>
    %c0_4 = arith.constant 0 : index
    %c0_5 = arith.constant 0 : index
    %7 = vector.load %arg3[%c0_4, %c0_5] : memref<1x1xf32, #tpu.memory_space<vmem>>, vector<1x1xf32>
    %8 = vector.shape_cast %6 : vector<48x128xf32> to vector<1x48x128xf32>
    %cst = arith.constant dense<0.000000e+00> : vector<1xf32>
    %9 = vector.multi_reduction <add>, %8, %cst [1, 2] : vector<1x48x128xf32> to vector<1xf32>
    %10 = vector.shape_cast %9 : vector<1xf32> to vector<1x1x1xf32>
    %11 = vector.extract %10[0, 0, 0] : f32 from vector<1x1x1xf32>
    %12 = vector.broadcast %11 : f32 to vector<1x1xf32>
    %13 = arith.addf %7, %12 : vector<1x1xf32>
    %c0_6 = arith.constant 0 : index
    %c0_7 = arith.constant 0 : index
    %14 = vector.load %arg3[%c0_6, %c0_7] : memref<1x1xf32, #tpu.memory_space<vmem>>, vector<1x1xf32>
    tpu.vector_store %arg3[%c0_6, %c0_7], %13 {strides = array<i32>} : memref<1x1xf32, #tpu.memory_space<vmem>>, vector<1x1xf32>,
    return
  }
  func.func @transform_0(%arg0: i32) -> (i32, i32) {
    %c0_i32 = arith.constant 0 : i32
    %c0_i32_0 = arith.constant 0 : i32
    return %arg0, %c0_i32 : i32, i32
  }
  func.func @transform_1(%arg0: i32) -> (i32, i32) {
    %c0_i32 = arith.constant 0 : i32
    %c0_i32_0 = arith.constant 0 : i32
    return %arg0, %c0_i32 : i32, i32
  }
  func.func @transform_2(%arg0: i32) -> (i32, i32) {
    %c0_i32 = arith.constant 0 : i32
    %c0_i32_0 = arith.constant 0 : i32
    %c0_i32_1 = arith.constant 0 : i32
    return %c0_i32, %c0_i32_0 : i32, i32
  }
}

</mosaic_0001>

<bundles_post_ra>
// kernel: tpu_custom_call.1
= control target key start
LH: loop header
LB: loop body
LE: loop exit
PB: predicated region body
PF: predicated region fallthrough
CT: control target
= control target key end

     0   :  { %7 = vsyncpa [#allocation3], 0  ;;  %s244_s0 = inlined_call_operand.hbm [shape: f32[48,128], index: 0, kind: input, shape index: {}]   ;;  %s245_s1 = inlined_call_operand.hbm [shape: f32[48,128], index: 1, kind: input, shape index: {}]   ;;  %s246_s2 = inlined_call_operand.hbm [shape: f32[1,1], index: 2, kind: output, shape index: {}]  }
   0x1   :  { %8 = vsyncpa [#allocation6], 0 }
   0x2   :  { %9 = vsyncpa [#allocation4], 0  ;;  %s185_s9 = smov [#allocation2]   ;;  %s113_s13 = scalar_lea.hbm %s244_s0, 768 }
   0x3   :  { %s15_s10 = sshll.u32 %s185_s9, 4  ;;  %p114_p0 = scmp.ne.s32.totalorder %s244_s0, %s113_s13  ;;  %s16_s10 = int_to_ptr.vmem [resolvable:$true] %s15_s10 }
   0x4   :  { %p117_p1 = scmp.lt.u32.totalorder %s113_s13, %s244_s0 }
   0x6   :  { %p119_p2 = pnand %p117_p1, %p114_p0 }
   0x8   :  { %122 = shalt.err (!%p119_p2)
}
   0x9   :  { %s123_s18 = scalar_lea.vmem %s16_s10, 768  ;;  %p128_p4 = scmp.lt.s32.totalorder %s16_s10, %s16_s10 }
   0xa   :  { %p124_p3 = scmp.ne.s32.totalorder %s16_s10, %s123_s18  ;;  %p129_p5 = scmp.lt.s32.totalorder %s123_s18, %s123_s18 }
   0xc   :  { %p130_p6 = por %p129_p5, %p128_p4 }
   0xe   :  { %p131_p7 = pnand %p130_p6, %p124_p3 }
  0x10   :  { %134 = shalt.err (!%p131_p7)
}
  0x11   :  { %s186_s19 = smov 128   ;;  %s187_s20 = smov 8  }
  0x12   :  { %21 = dma.hbm_to_vmem [thread:$0]  %s244_s0, 768, %s16_s10, [#allocation3], %s186_s19, %s186_s19, %s187_s20  }
  0x13   :  { %s188_s23 = smov [#allocation5]   ;;  %s135_s27 = scalar_lea.hbm %s245_s1, 768 }
  0x14   :  { %s27_s24 = sshll.u32 %s188_s23, 4  ;;  %p136_p8 = scmp.ne.s32.totalorder %s245_s1, %s135_s27  ;;  %s28_s24 = int_to_ptr.vmem [resolvable:$true] %s27_s24 }
  0x15   :  { %p139_p9 = scmp.lt.u32.totalorder %s135_s27, %s245_s1 }
  0x17   :  { %p141_p10 = pnand %p139_p9, %p136_p8 }
  0x19   :  { %144 = shalt.err (!%p141_p10)
}
  0x1a   :  { %s145_s4 = scalar_lea.vmem %s28_s24, 768  ;;  %p150_p12 = scmp.lt.s32.totalorder %s28_s24, %s28_s24 }
  0x1b   :  { %p146_p11 = scmp.ne.s32.totalorder %s28_s24, %s145_s4  ;;  %p151_p13 = scmp.lt.s32.totalorder %s145_s4, %s145_s4 }
  0x1d   :  { %p152_p0 = por %p151_p13, %p150_p12 }
  0x1f   :  { %p153_p1 = pnand %p152_p0, %p146_p11 }
  0x21   :  { %156 = shalt.err (!%p153_p1)
}
  0x22   :  { %33 = dma.hbm_to_vmem [thread:$0]  %s245_s1, 768, %s28_s24, [#allocation6], %s186_s19, %s186_s19, %s187_s20  }
  0x23   :  { %179 = dma.done.wait [#allocation3], 768  }
  0x24   :  { %180 = vsyncadd [#allocation3], 4294966528 }
  0x25   :  { %181 = dma.done.wait [#allocation6], 768  }
  0x26   :  { %182 = vsyncadd [#allocation6], 4294966528  ;;  %v46_v0 = vld [vmem:[#allocation2] sm:$0xff]  ;;  %v47_v1 = vld [vmem:[#allocation2 + $0x8] sm:$0xff]  ;;  %vm44_vm0 = vcmask 0   ;;  %v189_v29 = vmov 0.0  }
  0x27   :  { %v48_v2 = vld [vmem:[#allocation2 + $0x10] sm:$0xff]  ;;  %v49_v3 = vld [vmem:[#allocation2 + $0x18] sm:$0xff]  ;;  %v50_v4 = vld [vmem:[#allocation2 + $0x20] sm:$0xff]  ;;  %45 = vst.msk [vmem:[#allocation7] sm:$0x1] %vm44_vm0, %v189_v29  ;;  %s190_s1 = smov [#allocation7]  }
  0x28   :  { %v52_v5 = vld [vmem:[#allocation5] sm:$0xff]  ;;  %v53_v6 = vld [vmem:[#allocation5 + $0x8] sm:$0xff]  ;;  %v54_v7 = vld [vmem:[#allocation5 + $0x10] sm:$0xff]  ;;  %s95_s6 = sshll.u32 %s190_s1, 4  ;;  %s96_s6 = int_to_ptr.vmem [resolvable:$true] %s95_s6 }
  0x29   :  { %v55_v8 = vld [vmem:[#allocation5 + $0x18] sm:$0xff]  ;;  %v56_v9 = vld [vmem:[#allocation5 + $0x20] sm:$0xff]  ;;  %v58_v10 = vsub.f32 %v46_v0, %v52_v5  ;;  %v59_v11 = vsub.f32 %v47_v1, %v53_v6  ;;  %v60_v12 = vsub.f32 %v48_v2, %v54_v7  ;;  %v57_v14 = vld [vmem:[#allocation5 + $0x28] sm:$0xff]  ;;  %s157_s8 = scalar_lea.vmem %s96_s6, 16  ;;  %s161_s9 = scalar_lea.vmem %s96_s6, 32 }
  0x2a   :  { %v51_v13 = vld [vmem:[#allocation2 + $0x28] sm:$0xff]  ;;  %v61_v15 = vsub.f32 %v49_v3, %v55_v8  ;;  %v62_v16 = vsub.f32 %v50_v4, %v56_v9  ;;  %p158_p2 = scmp.ne.s32.totalorder %s96_s6, %s157_s8  ;;  %p162_p3 = scmp.lt.s32.totalorder %s96_s6, %s96_s6 }
  0x2b   :  { %v64_v17 = vand.u32 2147483647, %v58_v10  ;;  %v65_v18 = vand.u32 2147483647, %v59_v11  ;;  %v66_v19 = vand.u32 2147483647, %v60_v12  ;;  %v63_v20 = vsub.f32 %v51_v13, %v57_v14  ;;  %p163_p4 = scmp.lt.s32.totalorder %s161_s9, %s157_s8 }
  0x2c   :  { %v67_v21 = vand.u32 2147483647, %v61_v15  ;;  %v68_v23 = vand.u32 2147483647, %v62_v16 }
  0x2d   :  { %v71_v22 = vadd.f32 %v65_v18, %v64_v17  ;;  %v69_v25 = vand.u32 2147483647, %v63_v20  ;;  %p164_p5 = por %p163_p4, %p162_p3 }
  0x2e   :  { %v70_v37 = vld [vmem:[#allocation7] sm:$0x1] }
  0x2f   :  { %v72_v24 = vadd.f32 %v71_v22, %v66_v19  ;;  %p165_p6 = pnand %p164_p5, %p158_p2 }
  0x31   :  { %v73_v26 = vadd.f32 %v72_v24, %v67_v21 }
  0x33   :  { %v74_v27 = vadd.f32 %v73_v26, %v68_v23 }
  0x35   :  { %v75_v28 = vadd.f32 %v74_v27, %v69_v25 }
  0x37   :  { %76 = vadd.xlane.f32.xlu0 %v75_v28 }
  0xc4   :  { %v77_v30 = vpop.xlane.xlu0 %76 }
  0xc5   :  { %v78_v31 = vrot.slane %v77_v30, 4 }
  0xc7   :  { %v79_v32 = vadd.f32 %v78_v31, %v77_v30 }
  0xc9   :  { %v80_v33 = vrot.slane %v79_v32, 2 }
  0xcb   :  { %v81_v34 = vadd.f32 %v80_v33, %v79_v32 }
  0xcd   :  { %v82_v35 = vrot.slane %v81_v34, 1 }
  0xcf   :  { %v83_v36 = vadd.f32 %v82_v35, %v81_v34 }
  0xd1   :  { %105 = vpush %v83_v36 }
 0x102   :  { %s106_s7 = spop %105 }
 0x103   :  { %v85_v38 = vstv %s106_s7 }
 0x104   :  { %v86_v39 = vadd.f32 %v85_v38, %v70_v37 }
 0x106   :  { %88 = vst.msk [vmem:[#allocation7] sm:$0x1] %vm44_vm0, %v86_v39 }
 0x107   :  { %168 = shalt.err (!%p165_p6)
}
 0x108   :  { %s169_s12 = scalar_lea.hbm %s246_s2, 16 }
 0x109   :  { %p170_p7 = scmp.ne.s32.totalorder %s246_s2, %s169_s12  ;;  %p173_p8 = scmp.lt.u32.totalorder %s169_s12, %s246_s2 }
 0x10b   :  { %p175_p9 = pnand %p173_p8, %p170_p7 }
 0x10d   :  { %178 = shalt.err (!%p175_p9)
}
 0x10e   :  { %98 = dma.vmem_to_hbm [thread:$0]  %s96_s6, 16, %s246_s2, [#allocation4]  }
 0x10f   :  { %183 = dma.done.wait [#allocation4], 16  }
 0x110   :  { %184 = vsyncadd [#allocation4], 4294967280 }
 0x111   :  { %102 = vsyncpa [#allocation3], 1 }
 0x112   :  { %103 = vsyncpa [#allocation6], 1 }
 0x113   :  { %104 = vsyncpa [#allocation4], 1 }

</bundles_post_ra>
